<compile_context>
chip_gen: v7x
topology: tpu7x:2x2x1
jax: 0.10.0
libtpu: 0.0.40
codegen_flags: <defaults>
</compile_context>

<pallas_src>
import jax
import jax.numpy as jnp
from jax.experimental import pallas as pl
from jax.experimental.pallas import tpu as pltpu


def _cnet_kernel(x_ref, w1_ref, b1_ref, w2_ref, b2_ref, o_ref):
    # In-kernel bf16 cast of the activations (VPU work, saves a full HBM pass in
    # the wrapper); MXU matmul with f32 accumulation.
    x = x_ref[...].astype(w1_ref.dtype)
    h = jnp.dot(x, w1_ref[...], preferred_element_type=jnp.float32)
    h = h + b1_ref[...]                                  # (TM, Hp) + (1, Hp)
    # LeakyReLU(0.2): max(h, 0.2*h) — one vmul + one vmax per element, f32 epilogue
    # (v5e has no bf16 VPU/EUP).
    h = jnp.maximum(h, 0.2 * h)
    # fc2: cast activations back to the MXU dtype, accumulate in f32.
    y = jnp.dot(h.astype(w2_ref.dtype), w2_ref[...],
                preferred_element_type=jnp.float32)
    y = y + b2_ref[...]                                  # (TM, O) + (1, O)
    # Sigmoid: exp and approximate reciprocal both land on the (otherwise idle)
    # EUP slot.  approx=True gives ~1e-4 rel error; use approx=False if exactness
    # matters.
    o_ref[...] = pl.reciprocal(1.0 + jnp.exp(-y), approx=True).astype(o_ref.dtype)


def _round_up(x, m):
    return ((x + m - 1) // m) * m


def prepare_cnet_params(w1, b1, w2, b2, *, matmul_dtype=jnp.bfloat16,
                        hidden_align=128):
    """One-time padding/casting of the parameters (hoisted out of the forward).

    w1: (input_dim, hidden), b1: (hidden,), w2: (hidden, output_dim), b2: (output_dim,)
    Only the hidden dim is padded (to `hidden_align`); padded W1 columns / W2 rows
    are zero, so the forward semantics are unchanged.  Use hidden_align=256 to fill
    the v6e/v7x MXU once hidden dims are large enough to be compute-bound.
    """
    d_in, hidden = w1.shape
    d_out = w2.shape[1]
    h_pad = _round_up(hidden, hidden_align)

    w1_p = jnp.zeros((d_in, h_pad), matmul_dtype).at[:, :hidden].set(
        w1.astype(matmul_dtype))
    b1_p = jnp.zeros((1, h_pad), jnp.float32).at[0, :hidden].set(
        b1.astype(jnp.float32))
    w2_p = jnp.zeros((h_pad, d_out), matmul_dtype).at[:hidden, :].set(
        w2.astype(matmul_dtype))
    b2_p = b2.astype(jnp.float32).reshape(1, d_out)
    return w1_p, b1_p, w2_p, b2_p


def cnet_forward(x, params, *, tile_m=512):
    """x: (B, input_dim) float32/bf16; params: output of prepare_cnet_params."""
    w1_p, b1_p, w2_p, b2_p = params
    B, d_in = x.shape
    assert w1_p.shape[0] == d_in, "input_dim mismatch with prepared params"
    h_pad = w1_p.shape[1]
    d_out = w2_p.shape[1]
    out_dtype = x.dtype

    # ---- batch tiling -------------------------------------------------------
    # Sublane-aligned (multiple of 8) tiles; don't over-pad tiny batches, and
    # prefer >= 2 grid steps so v7x's two TensorCores both get work.
    tile_m = min(tile_m, _round_up(B, 8))
    if B > 8:
        tile_m = min(tile_m, _round_up(pl.cdiv(B, 2), 8))
    tile_m = max(8, _round_up(tile_m, 8))

    # ---- VMEM budget (includes the f32 hidden activation + its bf16 recast) ---
    try:
        vmem_cap = int(pltpu.get_tpu_info().vmem_capacity_bytes)
    except Exception:
        vmem_cap = 64 * 1024 * 1024  # v7x (most restrictive) fallback

    lanes = lambda n: _round_up(n, 128)
    w_item = jnp.dtype(w1_p.dtype).itemsize
    x_item = jnp.dtype(x.dtype).itemsize
    o_item = jnp.dtype(out_dtype).itemsize

    def vmem_estimate(tm):
        x_b = 2 * tm * lanes(d_in) * x_item                      # double-buffered x
        o_b = 2 * tm * lanes(d_out) * o_item                     # double-buffered out
        h_b = tm * lanes(h_pad) * (4 + w_item)                   # f32 h + bf16 recast
        w_b = 2 * (_round_up(d_in, 8) * lanes(h_pad)
                   + _round_up(h_pad, 8) * lanes(d_out)) * w_item  # resident weights
        b_b = 2 * 8 * (lanes(h_pad) + lanes(d_out)) * 4            # resident biases
        return x_b + o_b + h_b + w_b + b_b + (2 << 20)             # + margin

    budget = int(vmem_cap * 0.8)
    while tile_m > 8 and vmem_estimate(tile_m) > budget:
        tile_m = max(8, _round_up(tile_m // 2, 8))

    grid_m = pl.cdiv(B, tile_m)
    B_pad = grid_m * tile_m
    # Only the batch dim is ever padded, and only when needed (demo: no pad at all).
    x_in = x if B_pad == B else jnp.pad(x, ((0, B_pad - B), (0, 0)))

    vmem_limit = int(min(max(vmem_estimate(tile_m), 32 * 1024 * 1024),
                         int(vmem_cap * 0.9)))

    out = pl.pallas_call(
        _cnet_kernel,
        out_shape=jax.ShapeDtypeStruct((B_pad, d_out), out_dtype),
        grid_spec=pltpu.PrefetchScalarGridSpec(
            num_scalar_prefetch=0,
            grid=(grid_m,),
            in_specs=[
                # x tile: full-extent last dim (exempt from the 128-lane rule)
                pl.BlockSpec((tile_m, d_in), lambda i: (i, 0)),
                # grid-constant operands: fetched once, VMEM resident
                pl.BlockSpec((d_in, h_pad), lambda i: (0, 0)),    # W1
                pl.BlockSpec((1, h_pad), lambda i: (0, 0)),       # b1
                pl.BlockSpec((h_pad, d_out), lambda i: (0, 0)),   # W2
                pl.BlockSpec((1, d_out), lambda i: (0, 0)),       # b2
            ],
            # unpadded output: full-extent last dim, no 16x write amplification
            out_specs=pl.BlockSpec((tile_m, d_out), lambda i: (i, 0)),
        ),
        compiler_params=pltpu.CompilerParams(
            dimension_semantics=("parallel",),
            vmem_limit_bytes=vmem_limit,
        ),
    )(x_in, w1_p, b1_p, w2_p, b2_p)

    return out if B_pad == B else out[:B]


def xavier_normal(key, fan_in, fan_out, dtype=jnp.float32):
    # matches torch.nn.init.xavier_normal_: std = sqrt(2 / (fan_in + fan_out))
    std = (2.0 / (fan_in + fan_out)) ** 0.5
    return std * jax.random.normal(key, (fan_in, fan_out), dtype=dtype)


if __name__ == "__main__":
    # Small shapes consistent with the module: Linear(in, hidden) -> Linear(hidden, out)
    B, input_dim, hidden_dim, output_dim = 8, 16, 32, 8

    key = jax.random.PRNGKey(0)
    kx, k1, k2 = jax.random.split(key, 3)

    x = jax.random.normal(kx, (B, input_dim), dtype=jnp.float32)

    # Deterministic parameter init (xavier-normal weights, zero biases), as in weight_init()
    w1 = xavier_normal(k1, input_dim, hidden_dim)     # stored (in, out)
    b1 = jnp.zeros((hidden_dim,), jnp.float32)
    w2 = xavier_normal(k2, hidden_dim, output_dim)
    b2 = jnp.zeros((output_dim,), jnp.float32)

    # One-time parameter prep (padding + bf16 cast hoisted out of the call path).
    params = prepare_cnet_params(w1, b1, w2, b2)

    out = cnet_forward(x, params)
    out = jax.block_until_ready(out)

    # Pure-JAX reference with the same bf16 rounding of the matmul operands
    # (f32 accumulation), matching the kernel's numerics.
    xb = x.astype(jnp.bfloat16).astype(jnp.float32)
    w1b = w1.astype(jnp.bfloat16).astype(jnp.float32)
    w2b = w2.astype(jnp.bfloat16).astype(jnp.float32)
    h_ref = xb @ w1b + b1
    h_ref = jnp.where(h_ref > 0, h_ref, 0.2 * h_ref)
    h_ref = h_ref.astype(jnp.bfloat16).astype(jnp.float32)
    y_ref = jax.nn.sigmoid(h_ref @ w2b + b2)

    assert out.shape == (B, output_dim)
    assert jnp.allclose(out, y_ref, atol=2e-3, rtol=2e-3), "mismatch vs reference"

    print("KERNEL_OK")
</pallas_src>

<mosaic_0001>
module attributes {stable_mosaic.version = 11 : i64} {
  func.func @_cnet_kernel(%arg0: i32, %arg1: memref<8x16xf32, #tpu.memory_space<vmem>>, %arg2: memref<16x128xbf16, #tpu.memory_space<vmem>>, %arg3: memref<1x128xf32, #tpu.memory_space<vmem>>, %arg4: memref<128x8xbf16, #tpu.memory_space<vmem>>, %arg5: memref<1x8xf32, #tpu.memory_space<vmem>>, %arg6: memref<8x8xf32, #tpu.memory_space<vmem>>) attributes {dimension_semantics = [#tpu.dimension_semantics<parallel>], iteration_bounds = array<i64: 1>, scalar_prefetch = 0 : i64, scratch_operands = 0 : i64, tpu.core_type = #tpu.core_type<tc>, window_params = [{transform_indices = @transform_0, window_bounds = array<i64: 8, 16>}, {pipeline_mode = #tpu.pipeline_mode<synchronous>, transform_indices = @transform_1, window_bounds = array<i64: 16, 128>}, {pipeline_mode = #tpu.pipeline_mode<synchronous>, transform_indices = @transform_2, window_bounds = array<i64: 1, 128>}, {pipeline_mode = #tpu.pipeline_mode<synchronous>, transform_indices = @transform_3, window_bounds = array<i64: 128, 8>}, {pipeline_mode = #tpu.pipeline_mode<synchronous>, transform_indices = @transform_4, window_bounds = array<i64: 1, 8>}, {transform_indices = @transform_5, window_bounds = array<i64: 8, 8>}]} {
    %c0 = arith.constant 0 : index
    %c0_0 = arith.constant 0 : index
    %0 = vector.load %arg1[%c0, %c0_0] : memref<8x16xf32, #tpu.memory_space<vmem>>, vector<8x16xf32>
    %1 = arith.truncf %0 : vector<8x16xf32> to vector<8x16xbf16>
    %c0_1 = arith.constant 0 : index
    %c0_2 = arith.constant 0 : index
    %2 = vector.load %arg2[%c0_1, %c0_2] : memref<16x128xbf16, #tpu.memory_space<vmem>>, vector<16x128xbf16>
    %cst = arith.constant dense<0.000000e+00> : vector<8x128xf32>
    %3 = tpu.matmul %1, %2, %cst {dimension_numbers = #tpu.dot_dimension_numbers<[1], [0], [0], [1], [0, 0, 1, 1], [], []>} : vector<8x16xbf16>, vector<16x128xbf16>, vector<8x128xf32> -> vector<8x128xf32>
    %c0_3 = arith.constant 0 : index
    %c0_4 = arith.constant 0 : index
    %4 = vector.load %arg3[%c0_3, %c0_4] : memref<1x128xf32, #tpu.memory_space<vmem>>, vector<1x128xf32>
    %5 = vector.broadcast %4 : vector<1x128xf32> to vector<8x128xf32>
    %6 = arith.addf %3, %5 : vector<8x128xf32>
    %cst_5 = arith.constant 2.000000e-01 : f32
    %7 = vector.broadcast %cst_5 : f32 to vector<8x128xf32>
    %8 = arith.mulf %7, %6 : vector<8x128xf32>
    %9 = arith.maximumf %6, %8 : vector<8x128xf32>
    %10 = arith.truncf %9 : vector<8x128xf32> to vector<8x128xbf16>
    %c0_6 = arith.constant 0 : index
    %c0_7 = arith.constant 0 : index
    %11 = vector.load %arg4[%c0_6, %c0_7] : memref<128x8xbf16, #tpu.memory_space<vmem>>, vector<128x8xbf16>
    %cst_8 = arith.constant dense<0.000000e+00> : vector<8x8xf32>
    %12 = tpu.matmul %10, %11, %cst_8 {dimension_numbers = #tpu.dot_dimension_numbers<[1], [0], [0], [1], [0, 0, 1, 1], [], []>} : vector<8x128xbf16>, vector<128x8xbf16>, vector<8x8xf32> -> vector<8x8xf32>
    %c0_9 = arith.constant 0 : index
    %c0_10 = arith.constant 0 : index
    %13 = vector.load %arg5[%c0_9, %c0_10] : memref<1x8xf32, #tpu.memory_space<vmem>>, vector<1x8xf32>
    %14 = vector.broadcast %13 : vector<1x8xf32> to vector<8x8xf32>
    %15 = arith.addf %12, %14 : vector<8x8xf32>
    %cst_11 = arith.constant 0.000000e+00 : f32
    %16 = vector.broadcast %cst_11 : f32 to vector<8x8xf32>
    %17 = arith.subf %16, %15 : vector<8x8xf32>
    %18 = math.exp %17 : vector<8x8xf32>
    %cst_12 = arith.constant 1.000000e+00 : f32
    %19 = vector.broadcast %cst_12 : f32 to vector<8x8xf32>
    %20 = arith.addf %19, %18 : vector<8x8xf32>
    %21 = tpu.reciprocal %20 {approx = true} : vector<8x8xf32> -> vector<8x8xf32>
    %c0_13 = arith.constant 0 : index
    %c0_14 = arith.constant 0 : index
    %22 = vector.load %arg6[%c0_13, %c0_14] : memref<8x8xf32, #tpu.memory_space<vmem>>, vector<8x8xf32>
    tpu.vector_store %arg6[%c0_13, %c0_14], %21 {strides = array<i32>} : memref<8x8xf32, #tpu.memory_space<vmem>>, vector<8x8xf32>,
    return
  }
  func.func @transform_0(%arg0: i32) -> (i32, i32) {
    %c0_i32 = arith.constant 0 : i32
    %c0_i32_0 = arith.constant 0 : i32
    return %arg0, %c0_i32 : i32, i32
  }
  func.func @transform_1(%arg0: i32) -> (i32, i32) {
    %c0_i32 = arith.constant 0 : i32
    %c0_i32_0 = arith.constant 0 : i32
    %c0_i32_1 = arith.constant 0 : i32
    return %c0_i32, %c0_i32_0 : i32, i32
  }
  func.func @transform_2(%arg0: i32) -> (i32, i32) {
    %c0_i32 = arith.constant 0 : i32
    %c0_i32_0 = arith.constant 0 : i32
    %c0_i32_1 = arith.constant 0 : i32
    return %c0_i32, %c0_i32_0 : i32, i32
  }
  func.func @transform_3(%arg0: i32) -> (i32, i32) {
    %c0_i32 = arith.constant 0 : i32
    %c0_i32_0 = arith.constant 0 : i32
    %c0_i32_1 = arith.constant 0 : i32
    return %c0_i32, %c0_i32_0 : i32, i32
  }
  func.func @transform_4(%arg0: i32) -> (i32, i32) {
    %c0_i32 = arith.constant 0 : i32
    %c0_i32_0 = arith.constant 0 : i32
    %c0_i32_1 = arith.constant 0 : i32
    return %c0_i32, %c0_i32_0 : i32, i32
  }
  func.func @transform_5(%arg0: i32) -> (i32, i32) {
    %c0_i32 = arith.constant 0 : i32
    %c0_i32_0 = arith.constant 0 : i32
    return %arg0, %c0_i32 : i32, i32
  }
}

</mosaic_0001>

<bundles_post_ra>
// kernel: tpu_custom_call.1
= control target key start
LH: loop header
LB: loop body
LE: loop exit
PB: predicated region body
PF: predicated region fallthrough
CT: control target
= control target key end

     0   :  { %v307_v1 = vmov 0.0   ;;  %vm39_vm0 = vcmask 130048   ;;  %vm308_vm1 = vmmov 0   ;;  %s388_s0 = inlined_call_operand.vmem [shape: f32[8,16], index: 0, kind: input, shape index: {}]   ;;  %s389_s1 = inlined_call_operand.vmem [shape: bf16[16,128], index: 1, kind: input, shape index: {}]   ;;  %s390_s2 = inlined_call_operand.vmem [shape: f32[1,128], index: 2, kind: input, shape index: {}]   ;;  %s391_s3 = inlined_call_operand.vmem [shape: bf16[128,8], index: 3, kind: input, shape index: {}]   ;;  %s392_s4 = inlined_call_operand.vmem [shape: f32[1,8], index: 4, kind: input, shape index: {}]   ;;  %s393_s5 = inlined_call_operand.hbm [shape: f32[8,8], index: 5, kind: output, shape index: {}]  }
   0x1   :  { %v270_v0 = vld [vmem:[%s389_s1] sm:$0xff]   ;;  %241 = vmatprep.subr.bf16.mxu0 %v307_v1  ;;  %247 = vmatprep.subr.bf16.mxu1 %v307_v1  ;;  %v272_v5 = vld [vmem:[%s391_s3 + $0x8] sm:$0xff]   ;;  %v273_v6 = vld [vmem:[%s391_s3 + $0x10] sm:$0xff]  }
   0x2   :  { %v22_v2 = vld [vmem:[%s388_s0] sm:$0xff]  ;;  %242 = vmatpush3.bf16.msra.mxu0 %v270_v0  ;;  %243 = vmatprep.mubr.msk.bf16.mxu0 %vm308_vm1, %v307_v1 }
   0x3   :  { %v271_v3 = vld [vmem:[%s391_s3] sm:$0xff]   ;;  %v23_v4 = vpack.c.bf16 %v22_v2, %v22_v2  ;;  %263 = vmatprep.mubr.msk.bf16.mxu1 %vm308_vm1, %v307_v1 }
   0x4   :  { %248 = vmatpush3.bf16.msra.mxu1 %v271_v3 }
   0x5   :  { %249 = vmatprep.subr.bf16.mxu1 %v307_v1  ;;  %244 = vmatmul.mubr.msk.bf16.vlgmr.msra.gmra.mrb[0].mxu0 %vm39_vm0, %v23_v4 }
   0x8   :  { %250 = vmatpush3.bf16.msra.mxu1 %v272_v5 }
   0x9   :  { %251 = vmatprep.subr.bf16.mxu1 %v307_v1 }
   0xa   :  { %10 = vsyncpa [#allocation3], 0  ;;  %v274_v7 = vld [vmem:[%s391_s3 + $0x18] sm:$0xff]   ;;  %v275_v8 = vld [vmem:[%s391_s3 + $0x20] sm:$0xff]   ;;  %vm202_vm2 = vcmask 64512  }
   0xb   :  { %v276_v9 = vld [vmem:[%s391_s3 + $0x28] sm:$0xff]   ;;  %v277_v10 = vld [vmem:[%s391_s3 + $0x30] sm:$0xff]   ;;  %v278_v11 = vld [vmem:[%s391_s3 + $0x38] sm:$0xff]  }
   0xc   :  { %252 = vmatpush3.bf16.msra.mxu1 %v273_v6  ;;  %v218_v12 = vld [vmem:[%s390_s2] ss:$0 sm:$0xff]  ;;  %s309_s2 = smov [#allocation2]  }
   0xd   :  { %253 = vmatprep.subr.bf16.mxu1 %v307_v1  ;;  %v221_v21 = vld [vmem:[%s392_s4] ss:$0 sm:$0xff]  ;;  %s210_s3 = sshll.u32 %s309_s2, 4  ;;  %s211_s3 = int_to_ptr.vmem [resolvable:$true] %s210_s3 }
   0xe   :  { %s283_s15 = scalar_lea.vmem %s211_s3, 128  ;;  %p288_p1 = scmp.lt.s32.totalorder %s211_s3, %s211_s3 }
   0xf   :  { %p284_p0 = scmp.ne.s32.totalorder %s211_s3, %s283_s15  ;;  %p289_p2 = scmp.lt.s32.totalorder %s283_s15, %s283_s15 }
  0x10   :  { %254 = vmatpush3.bf16.msra.mxu1 %v274_v7 }
  0x11   :  { %255 = vmatprep.subr.bf16.mxu1 %v307_v1  ;;  %p290_p3 = por %p289_p2, %p288_p1 }
  0x13   :  { %p291_p4 = pnand %p290_p3, %p284_p0 }
  0x14   :  { %256 = vmatpush3.bf16.msra.mxu1 %v275_v8 }
  0x15   :  { %257 = vmatprep.subr.bf16.mxu1 %v307_v1 }
  0x18   :  { %258 = vmatpush3.bf16.msra.mxu1 %v276_v9 }
  0x19   :  { %259 = vmatprep.subr.bf16.mxu1 %v307_v1 }
  0x1c   :  { %260 = vmatpush3.bf16.msra.mxu1 %v277_v10 }
  0x1d   :  { %261 = vmatprep.subr.bf16.mxu1 %v307_v1 }
  0x20   :  { %262 = vmatpush3.bf16.msra.mxu1 %v278_v11 }
  0xd8   :  { %v77_v13 = vpop.f32.mrb[0].mxu0 }
  0xd9   :  { %v78_v14 = vadd.f32 %v218_v12, %v77_v13  ;;  %v245_v15 = vpop.f32.mrb[1].mxu0 }
  0xda   :  { %v80_v16 = vpop.f32.mrb[2].mxu0 }
  0xdb   :  { %v83_v17 = vmul.f32 0.2, %v78_v14  ;;  %v246_v18 = vpop.f32.mrb[3].mxu0 }
  0xdd   :  { %v84_v19 = vmax.f32 %v78_v14, %v83_v17 }
  0xdf   :  { %v85_v20 = vpack.c.bf16 %v84_v19, %v84_v19 }
  0xe1   :  { %264 = vmatmul.mubr.bf16.vlgmr.msra.gmra.mrb[0].mxu1 %v85_v20 }
 0x1b4   :  { %v191_v22 = vpop.f32.mrb[0].mxu1 }
 0x1b5   :  { %v192_v23 = vadd.f32 %v221_v21, %v191_v22  ;;  %v265_v24 = vpop.f32.mrb[1].mxu1 }
 0x1b6   :  { %v194_v25 = vpop.f32.mrb[2].mxu1 }
 0x1b7   :  { %v197_v26 = vsub.f32 0.0, %v192_v23  ;;  %v266_v27 = vpop.f32.mrb[3].mxu1 }
 0x1b9   :  { %v198_v28 = vmul.f32 1.442695, %v197_v26 }
 0x1bb   :  { %279 = vpow2.f32 %v198_v28 }
 0x1c5   :  { %v280_v29 = vpop.eup %279 }
 0x1c6   :  { %v200_v30 = vadd.f32 1.0, %v280_v29 }
 0x1c8   :  { %281 = vrcp.f32 %v200_v30 }
 0x1d2   :  { %v282_v31 = vpop.eup %281 }
 0x1d3   :  { %203 = vst.msk [vmem:[#allocation2] sm:$0xff] %vm202_vm2, %v282_v31 }
 0x1d4   :  { %294 = shalt.err (!%p291_p4)
}
 0x1d5   :  { %s295_s17 = scalar_lea.hbm %s393_s5, 128 }
 0x1d6   :  { %p296_p5 = scmp.ne.s32.totalorder %s393_s5, %s295_s17  ;;  %p299_p6 = scmp.lt.u32.totalorder %s295_s17, %s393_s5 }
 0x1d8   :  { %p301_p7 = pnand %p299_p6, %p296_p5 }
 0x1da   :  { %304 = shalt.err (!%p301_p7)
}
 0x1db   :  { %213 = dma.vmem_to_hbm [thread:$0]  %s211_s3, 128, %s393_s5, [#allocation3]  }
 0x1dc   :  { %305 = dma.done.wait [#allocation3], 128  }
 0x1dd   :  { %306 = vsyncadd [#allocation3], 4294967168 }
 0x1de   :  { %217 = vsyncpa [#allocation3], 1 }

</bundles_post_ra>
